<compile_context>
chip_gen: v6e
topology: v6e:2x2x1
jax: 0.10.0
libtpu: 0.0.40
codegen_flags: <defaults>
</compile_context>

<pallas_src>
import functools

import jax
import jax.numpy as jnp
from jax.experimental import pallas as pl
from jax.experimental.pallas import tpu as pltpu

BN_EPS = 1e-5


def _round_up(x, m):
    return ((x + m - 1) // m) * m


def _cdiv(a, b):
    return (a + b - 1) // b


def _phys_vmem_bytes():
    try:
        return int(pltpu.get_tpu_info().vmem_capacity_bytes)
    except Exception:
        return 64 << 20  # conservative: v7x per-TensorCore VMEM


# ----------------------------------------------------------------------------- kernel
def _derm_kernel(
    x_ref,      # (R, hw_tile)   image rows (R = b_tile*C, sublane-dense), f32
    t_ref,      # (b_tile, R)    0/1 "flattened row -> batch" matrix
    w1e_ref,    # (R, 512)       fc1 (stem-folded), expanded per row channel
    b1_ref,     # (1, 512)
    w2_ref,     # (512, 256)     fc2 with BN1 folded in
    b2_ref,     # (1, 256)
    w3_ref,     # (256, OUT_PAD) fc3 with BN2 folded in, zero-padded lanes
    b3_ref,     # (1, OUT_PAD)
    o_ref,      # (b_tile, OUT_PAD) lane-dense logits block
    acc_ref,    # (R, 128)       lane-dense GAP partial sums (f32 scratch)
    *,
    hw,             # true H*W (static)
    hw_tile,        # spatial block width (static, multiple of 128)
    rows_per_tile,  # R = b_tile * C (static)
    rows_total,     # B * C, valid rows of the flattened image (static)
    inv_hw,         # 1.0 / (H*W) (static)
):
    i = pl.program_id(0)
    k = pl.program_id(1)
    n_k = pl.num_programs(1)
    n_chunks = hw_tile // 128

    @pl.when(k == 0)
    def _init():
        acc_ref[...] = jnp.zeros_like(acc_ref)

    # Lane-dense partial GAP: unrolled 128-lane chunk adds into a (R, 128)
    # register accumulator; one acc load + one acc store per grid step.
    def accumulate(mask_tail_cols):
        a = acc_ref[...]
        if mask_tail_cols:
            col = jax.lax.broadcasted_iota(jnp.int32, (rows_per_tile, 128), 1)
            valid = hw - k * hw_tile          # columns still inside the image
        for g in range(n_chunks):
            v = x_ref[:, pl.ds(g * 128, 128)]
            if mask_tail_cols:
                v = jnp.where(col < (valid - g * 128), v, 0.0)
            a = a + v
        acc_ref[...] = a

    if hw % hw_tile != 0:
        # Only the last spatial step is ragged; keep the hot path mask-free.
        @pl.when(k == n_k - 1)
        def _ragged():
            accumulate(True)

        @pl.when(k != n_k - 1)
        def _full():
            accumulate(False)
    else:
        accumulate(False)

    # Whole MLP head once per batch tile, hidden under the image stream.
    @pl.when(k == n_k - 1)
    def _head():
        # Zero rows past the real batch (stale VMEM could hold NaN/Inf).
        row_ids = jax.lax.broadcasted_iota(jnp.int32, (rows_per_tile, 128), 0)
        acc = jnp.where(row_ids < (rows_total - i * rows_per_tile),
                        acc_ref[...], 0.0)
        pooled = jnp.sum(acc, axis=-1, keepdims=True) * inv_hw          # (R, 1)
        # feats[b, :] = sum_c pooled[b*C+c] * w1f[c, :]  via  T @ (pooled * W1e)
        feats = jnp.dot(t_ref[...], pooled * w1e_ref[...],
                        preferred_element_type=jnp.float32)             # (b_tile, 512)
        h1 = jnp.maximum(feats + b1_ref[...], 0.0)
        h2 = jnp.maximum(
            jnp.dot(h1, w2_ref[...], preferred_element_type=jnp.float32)
            + b2_ref[...], 0.0)
        logits = jnp.dot(h2, w3_ref[...],
                         preferred_element_type=jnp.float32) + b3_ref[...]
        o_ref[...] = logits.astype(o_ref.dtype)


# ----------------------------------------------------------------------------- params
def fold_params(params):
    """Fold eval-mode BatchNorm into the NEXT Linear and the backbone stand-in
    projection into fc1; zero-pad the final Linear to 128 output lanes.

    BN(y) = y*s + t with s = g*rsqrt(v+eps), t = be - m*s, so
      BN(h) @ W + b = h @ (s[:,None]*W) + (t @ W + b)      (exact in f32)
    Stem fold: (pooled @ wstem) @ w1 == pooled @ (wstem @ w1) up to f32
    reassociation.
    """
    s1 = params["g1"] * jax.lax.rsqrt(params["v1"] + BN_EPS)   # (1, 512)
    t1 = params["be1"] - params["m1"] * s1
    s2 = params["g2"] * jax.lax.rsqrt(params["v2"] + BN_EPS)   # (1, 256)
    t2 = params["be2"] - params["m2"] * s2

    w1f = params["wstem"] @ params["w1"]                       # (C, 512)
    b1 = params["b1"]                                          # (1, 512)
    w2f = params["w2"] * s1.reshape(-1, 1)                     # (512, 256)
    b2f = t1 @ params["w2"] + params["b2"]                     # (1, 256)
    w3f = params["w3"] * s2.reshape(-1, 1)                     # (256, nc)
    b3f = t2 @ params["w3"] + params["b3"]                     # (1, nc)

    nc = params["w3"].shape[1]
    out_pad = _round_up(nc, 128)
    w3p = jnp.pad(w3f, ((0, 0), (0, out_pad - nc)))            # zero cols -> exact slice
    b3p = jnp.pad(b3f, ((0, 0), (0, out_pad - nc)))
    return w1f, b1, w2f, b2f, w3p, b3p


def init_params(key, in_channels=3, feature_dim=128, num_classes=7):
    """Parameters matching the module's init (Linear: N(0,0.01) weights, 0 bias).

    BatchNorm running stats / affine get non-trivial values (as after training)
    so the BN-folding path is exercised by the correctness check.
    """
    ks = jax.random.split(key, 12)
    f32 = jnp.float32

    def nrm(k, shape, std):
        return (std * jax.random.normal(k, shape)).astype(f32)

    return {
        # backbone stand-in projection (C -> feature_dim)
        "wstem": nrm(ks[0], (in_channels, feature_dim), 1.0),
        # Linear(feature_dim, 512): weight ~ N(0, 0.01), bias = 0
        "w1": nrm(ks[1], (feature_dim, 512), 0.01),
        "b1": jnp.zeros((1, 512), f32),
        # BatchNorm1d(512) eval-mode params
        "g1": (1.0 + 0.1 * jax.random.normal(ks[2], (1, 512))).astype(f32),
        "be1": nrm(ks[3], (1, 512), 0.1),
        "m1": nrm(ks[4], (1, 512), 0.1),
        "v1": (0.5 + jax.random.uniform(ks[5], (1, 512))).astype(f32),
        # Linear(512, 256)
        "w2": nrm(ks[6], (512, 256), 0.01),
        "b2": jnp.zeros((1, 256), f32),
        # BatchNorm1d(256)
        "g2": (1.0 + 0.1 * jax.random.normal(ks[7], (1, 256))).astype(f32),
        "be2": nrm(ks[8], (1, 256), 0.1),
        "m2": nrm(ks[9], (1, 256), 0.1),
        "v2": (0.5 + jax.random.uniform(ks[10], (1, 256))).astype(f32),
        # Linear(256, num_classes)
        "w3": nrm(ks[11], (256, num_classes), 0.01),
        "b3": jnp.zeros((1, num_classes), f32),
    }


# ----------------------------------------------------------------------------- wrapper
def derm_classifier_forward(x_nchw, params, *, b_tile=None, hw_tile=None):
    """x_nchw: (B, C, H, W) float32. Returns logits (B, num_classes)."""
    B, C, H, W = x_nchw.shape
    HW = H * W
    num_classes = params["w3"].shape[1]
    phys_vmem = _phys_vmem_bytes()

    # ---- batch tiling: <=128 rows/tile, minimal tail waste, >=2 tiles when
    #      the batch is big enough to split (feeds both v7x TensorCores).
    if b_tile is None:
        n_bt = max(1, _cdiv(B, 128))
        if n_bt < 2 and B >= 16:
            n_bt = 2
        b_tile = _round_up(_cdiv(B, n_bt), 8)
    else:
        b_tile = _round_up(min(int(b_tile), max(B, 1)), 8)

    R = b_tile * C                      # flattened image rows per tile

    # ---- spatial tiling: ~12 MiB per image buffer, lane aligned, <=64 chunks.
    if hw_tile is None:
        hw_tile = (12 << 20) // (R * 4)
        hw_tile = max(512, min(hw_tile, 8192))
    hw_tile = min(_round_up(int(hw_tile), 128), _round_up(HW, 128))

    grid = (_cdiv(B, b_tile), _cdiv(HW, hw_tile))

    # ---- parameter prep (BN + stem folding, lane padding, fc1 row expansion)
    w1f, b1, w2f, b2f, w3p, b3p = fold_params(params)
    out_pad = w3p.shape[1]
    w1e = jnp.tile(w1f, (b_tile, 1))                     # (R, 512): row r -> w1f[r % C]
    t_mat = (jnp.arange(R, dtype=jnp.int32)[None, :] // C
             == jnp.arange(b_tile, dtype=jnp.int32)[:, None]).astype(jnp.float32)

    # Flatten (B, C, H, W) -> (B*C, HW): metadata-only for contiguous NCHW; no
    # jnp.pad => no extra HBM round-trip. Ragged tails are masked in-kernel.
    x2d = x_nchw.reshape(B * C, HW)

    # ---- explicit, generation-aware VMEM budget (with headroom).
    wbytes = 4 * sum(int(a.size) for a in (t_mat, w1e, b1, w2f, b2f, w3p, b3p))
    est = (2 * R * hw_tile * 4          # double-buffered image stream
           + 2 * wbytes                 # resident weights (pipeline double-buffers)
           + 2 * b_tile * out_pad * 4   # output block
           + R * 128 * 4                # GAP accumulator scratch
           + (2 << 20))                 # slack (sublane padding of biases etc.)
    vmem_limit = int(min(max(est, 8 << 20), int(phys_vmem * 0.9)))

    kernel = functools.partial(
        _derm_kernel,
        hw=HW, hw_tile=hw_tile, rows_per_tile=R, rows_total=B * C,
        inv_hw=1.0 / HW)

    def resident(arr):
        # Same block index for every grid step -> stays in VMEM, no re-DMA.
        return pl.BlockSpec(arr.shape, lambda i, k: (0, 0))

    out = pl.pallas_call(
        kernel,
        out_shape=jax.ShapeDtypeStruct((B, out_pad), jnp.float32),
        grid_spec=pltpu.PrefetchScalarGridSpec(
            num_scalar_prefetch=0,
            grid=grid,
            in_specs=[
                # image: batch-tiled (parallel) x spatial-tiled (reduction, last)
                pl.BlockSpec((R, hw_tile), lambda i, k: (i, k)),
                resident(t_mat), resident(w1e), resident(b1),
                resident(w2f), resident(b2f), resident(w3p), resident(b3p),
            ],
            out_specs=pl.BlockSpec((b_tile, out_pad), lambda i, k: (i, 0)),
            scratch_shapes=[pltpu.VMEM((R, 128), jnp.float32)],
        ),
        compiler_params=pltpu.CompilerParams(
            dimension_semantics=("parallel", "arbitrary"),
            vmem_limit_bytes=vmem_limit,
        ),
    )(x2d, t_mat, w1e, b1, w2f, b2f, w3p, b3p)

    return out[:, :num_classes]


# ----------------------------------------------------------------------------- reference
def reference_forward(x_nchw, params):
    """Pure-JAX reference of the original (unfolded) math."""
    B, C, H, W = x_nchw.shape
    pooled = jnp.mean(x_nchw.reshape(B, C, H * W), axis=-1)
    feats = pooled @ params["wstem"]
    h1 = jnp.maximum(feats @ params["w1"] + params["b1"], 0.0)
    h1 = (h1 - params["m1"]) * jax.lax.rsqrt(params["v1"] + BN_EPS) * params["g1"] + params["be1"]
    h2 = jnp.maximum(h1 @ params["w2"] + params["b2"], 0.0)
    h2 = (h2 - params["m2"]) * jax.lax.rsqrt(params["v2"] + BN_EPS) * params["g2"] + params["be2"]
    return h2 @ params["w3"] + params["b3"]


if __name__ == "__main__":
    key = jax.random.PRNGKey(0)
    kx, kp = jax.random.split(key)

    # Small synthetic "dermatology image" batch: NCHW, 3 channels, ragged HW.
    B, C, H, W = 10, 3, 16, 10
    x = jax.random.normal(kx, (B, C, H, W), dtype=jnp.float32)
    params = init_params(kp, in_channels=C, feature_dim=128, num_classes=7)

    ref = reference_forward(x, params)

    # Small explicit tiles: exercises 2 batch tiles x 2 spatial steps, a ragged
    # spatial tail (160 % 128 != 0) and a ragged batch tail (10 % 8 != 0).
    logits = jax.block_until_ready(
        derm_classifier_forward(x, params, b_tile=8, hw_tile=128))
    assert logits.shape == (B, 7)
    assert jnp.allclose(logits, ref, atol=1e-5, rtol=1e-4), "mismatch vs JAX reference"

    # Auto tile-selection path (single batch tile, single masked spatial step).
    logits2 = jax.block_until_ready(derm_classifier_forward(x, params))
    assert logits2.shape == (B, 7)
    assert jnp.allclose(logits2, ref, atol=1e-5, rtol=1e-4), "mismatch vs JAX reference"

    print("KERNEL_OK")
</pallas_src>

<mosaic_0001>
module attributes {stable_mosaic.version = 11 : i64} {
  func.func @_derm_kernel(%arg0: i32, %arg1: i32, %arg2: memref<24x128xf32, #tpu.memory_space<vmem>>, %arg3: memref<8x24xf32, #tpu.memory_space<vmem>>, %arg4: memref<24x512xf32, #tpu.memory_space<vmem>>, %arg5: memref<1x512xf32, #tpu.memory_space<vmem>>, %arg6: memref<512x256xf32, #tpu.memory_space<vmem>>, %arg7: memref<1x256xf32, #tpu.memory_space<vmem>>, %arg8: memref<256x128xf32, #tpu.memory_space<vmem>>, %arg9: memref<1x128xf32, #tpu.memory_space<vmem>>, %arg10: memref<8x128xf32, #tpu.memory_space<vmem>>, %arg11: memref<24x128xf32, #tpu.memory_space<vmem>>) attributes {dimension_semantics = [#tpu.dimension_semantics<parallel>, #tpu.dimension_semantics<arbitrary>], iteration_bounds = array<i64: 2, 2>, scalar_prefetch = 0 : i64, scratch_operands = 1 : i64, tpu.core_type = #tpu.core_type<tc>, window_params = [{transform_indices = @transform_0, window_bounds = array<i64: 24, 128>}, {pipeline_mode = #tpu.pipeline_mode<synchronous>, transform_indices = @transform_1, window_bounds = array<i64: 8, 24>}, {pipeline_mode = #tpu.pipeline_mode<synchronous>, transform_indices = @transform_2, window_bounds = array<i64: 24, 512>}, {pipeline_mode = #tpu.pipeline_mode<synchronous>, transform_indices = @transform_3, window_bounds = array<i64: 1, 512>}, {pipeline_mode = #tpu.pipeline_mode<synchronous>, transform_indices = @transform_4, window_bounds = array<i64: 512, 256>}, {pipeline_mode = #tpu.pipeline_mode<synchronous>, transform_indices = @transform_5, window_bounds = array<i64: 1, 256>}, {pipeline_mode = #tpu.pipeline_mode<synchronous>, transform_indices = @transform_6, window_bounds = array<i64: 256, 128>}, {pipeline_mode = #tpu.pipeline_mode<synchronous>, transform_indices = @transform_7, window_bounds = array<i64: 1, 128>}, {transform_indices = @transform_8, window_bounds = array<i64: 8, 128>}]} {
    %c0_i32 = arith.constant 0 : i32
    %0 = arith.cmpi eq, %arg1, %c0_i32 : i32
    %1 = arith.extui %0 : i1 to i32
    %c0_i32_0 = arith.constant 0 : i32
    %2 = arith.cmpi ne, %1, %c0_i32_0 : i32
    scf.if %2 {
      %cst = arith.constant 0.000000e+00 : f32
      %12 = vector.broadcast %cst : f32 to vector<24x128xf32>
      %c0 = arith.constant 0 : index
      %c0_6 = arith.constant 0 : index
      %13 = vector.load %arg11[%c0, %c0_6] : memref<24x128xf32, #tpu.memory_space<vmem>>, vector<24x128xf32>
      tpu.vector_store %arg11[%c0, %c0_6], %12 {strides = array<i32>} : memref<24x128xf32, #tpu.memory_space<vmem>>, vector<24x128xf32>,
    } else {
    }
    %c1_i32 = arith.constant 1 : i32
    %3 = arith.cmpi eq, %arg1, %c1_i32 : i32
    %4 = arith.extui %3 : i1 to i32
    %c0_i32_1 = arith.constant 0 : i32
    %5 = arith.cmpi ne, %4, %c0_i32_1 : i32
    scf.if %5 {
      %c0 = arith.constant 0 : index
      %c0_6 = arith.constant 0 : index
      %12 = vector.load %arg11[%c0, %c0_6] : memref<24x128xf32, #tpu.memory_space<vmem>>, vector<24x128xf32>
      %13 = tpu.iota {dimensions = array<i32: 1>} : vector<24x128xi32>
      %c128_i32 = arith.constant 128 : i32
      %14 = arith.muli %arg1, %c128_i32 : i32
      %c160_i32 = arith.constant 160 : i32
      %15 = arith.subi %c160_i32, %14 : i32
      %c0_7 = arith.constant 0 : index
      %c0_8 = arith.constant 0 : index
      %16 = vector.load %arg2[%c0_7, %c0_8] : memref<24x128xf32, #tpu.memory_space<vmem>>, vector<24x128xf32>
      %c0_i32_9 = arith.constant 0 : i32
      %17 = arith.subi %15, %c0_i32_9 : i32
      %18 = vector.broadcast %17 : i32 to vector<24x128xi32>
      %19 = arith.cmpi slt, %13, %18 : vector<24x128xi32>
      %cst = arith.constant 0.000000e+00 : f32
      %20 = vector.broadcast %cst : f32 to vector<24x128xf32>
      %21 = arith.select %19, %16, %20 : vector<24x128xi1>, vector<24x128xf32>
      %22 = arith.addf %12, %21 : vector<24x128xf32>
      %c0_10 = arith.constant 0 : index
      %c0_11 = arith.constant 0 : index
      %23 = vector.load %arg11[%c0_10, %c0_11] : memref<24x128xf32, #tpu.memory_space<vmem>>, vector<24x128xf32>
      tpu.vector_store %arg11[%c0_10, %c0_11], %22 {strides = array<i32>} : memref<24x128xf32, #tpu.memory_space<vmem>>, vector<24x128xf32>,
    } else {
    }
    %c1_i32_2 = arith.constant 1 : i32
    %6 = arith.cmpi ne, %arg1, %c1_i32_2 : i32
    %7 = arith.extui %6 : i1 to i32
    %c0_i32_3 = arith.constant 0 : i32
    %8 = arith.cmpi ne, %7, %c0_i32_3 : i32
    scf.if %8 {
      %c0 = arith.constant 0 : index
      %c0_6 = arith.constant 0 : index
      %12 = vector.load %arg11[%c0, %c0_6] : memref<24x128xf32, #tpu.memory_space<vmem>>, vector<24x128xf32>
      %c0_7 = arith.constant 0 : index
      %c0_8 = arith.constant 0 : index
      %13 = vector.load %arg2[%c0_7, %c0_8] : memref<24x128xf32, #tpu.memory_space<vmem>>, vector<24x128xf32>
      %14 = arith.addf %12, %13 : vector<24x128xf32>
      %c0_9 = arith.constant 0 : index
      %c0_10 = arith.constant 0 : index
      %15 = vector.load %arg11[%c0_9, %c0_10] : memref<24x128xf32, #tpu.memory_space<vmem>>, vector<24x128xf32>
      tpu.vector_store %arg11[%c0_9, %c0_10], %14 {strides = array<i32>} : memref<24x128xf32, #tpu.memory_space<vmem>>, vector<24x128xf32>,
    } else {
    }
    %c1_i32_4 = arith.constant 1 : i32
    %9 = arith.cmpi eq, %arg1, %c1_i32_4 : i32
    %10 = arith.extui %9 : i1 to i32
    %c0_i32_5 = arith.constant 0 : i32
    %11 = arith.cmpi ne, %10, %c0_i32_5 : i32
    scf.if %11 {
      %12 = tpu.iota {dimensions = array<i32: 0>} : vector<24x128xi32>
      %c24_i32 = arith.constant 24 : i32
      %13 = arith.muli %arg0, %c24_i32 : i32
      %c30_i32 = arith.constant 30 : i32
      %14 = arith.subi %c30_i32, %13 : i32
      %15 = vector.broadcast %14 : i32 to vector<24x128xi32>
      %16 = arith.cmpi slt, %12, %15 : vector<24x128xi32>
      %c0 = arith.constant 0 : index
      %c0_6 = arith.constant 0 : index
      %17 = vector.load %arg11[%c0, %c0_6] : memref<24x128xf32, #tpu.memory_space<vmem>>, vector<24x128xf32>
      %cst = arith.constant 0.000000e+00 : f32
      %18 = vector.broadcast %cst : f32 to vector<24x128xf32>
      %19 = arith.select %16, %17, %18 : vector<24x128xi1>, vector<24x128xf32>
      %cst_7 = arith.constant dense<0.000000e+00> : vector<24xf32>
      %20 = vector.multi_reduction <add>, %19, %cst_7 [1] : vector<24x128xf32> to vector<24xf32>
      %21 = vector.shape_cast %20 : vector<24xf32> to vector<24x1xf32>
      %cst_8 = arith.constant 6.250000e-03 : f32
      %22 = vector.broadcast %cst_8 : f32 to vector<24x1xf32>
      %23 = arith.mulf %21, %22 : vector<24x1xf32>
      %c0_9 = arith.constant 0 : index
      %c0_10 = arith.constant 0 : index
      %24 = vector.load %arg3[%c0_9, %c0_10] : memref<8x24xf32, #tpu.memory_space<vmem>>, vector<8x24xf32>
      %c0_11 = arith.constant 0 : index
      %c0_12 = arith.constant 0 : index
      %25 = vector.load %arg4[%c0_11, %c0_12] : memref<24x512xf32, #tpu.memory_space<vmem>>, vector<24x512xf32>
      %26 = vector.broadcast %23 : vector<24x1xf32> to vector<24x512xf32>
      %27 = arith.mulf %26, %25 : vector<24x512xf32>
      %cst_13 = arith.constant dense<0.000000e+00> : vector<8x512xf32>
      %28 = tpu.matmul %24, %27, %cst_13 {dimension_numbers = #tpu.dot_dimension_numbers<[1], [0], [0], [1], [0, 0, 1, 1], [], []>} : vector<8x24xf32>, vector<24x512xf32>, vector<8x512xf32> -> vector<8x512xf32>
      %c0_14 = arith.constant 0 : index
      %c0_15 = arith.constant 0 : index
      %29 = vector.load %arg5[%c0_14, %c0_15] : memref<1x512xf32, #tpu.memory_space<vmem>>, vector<1x512xf32>
      %30 = vector.broadcast %29 : vector<1x512xf32> to vector<8x512xf32>
      %31 = arith.addf %28, %30 : vector<8x512xf32>
      %cst_16 = arith.constant 0.000000e+00 : f32
      %32 = vector.broadcast %cst_16 : f32 to vector<8x512xf32>
      %33 = arith.maximumf %31, %32 : vector<8x512xf32>
      %c0_17 = arith.constant 0 : index
      %c0_18 = arith.constant 0 : index
      %34 = vector.load %arg6[%c0_17, %c0_18] : memref<512x256xf32, #tpu.memory_space<vmem>>, vector<512x256xf32>
      %cst_19 = arith.constant dense<0.000000e+00> : vector<8x256xf32>
      %35 = tpu.matmul %33, %34, %cst_19 {dimension_numbers = #tpu.dot_dimension_numbers<[1], [0], [0], [1], [0, 0, 1, 1], [], []>} : vector<8x512xf32>, vector<512x256xf32>, vector<8x256xf32> -> vector<8x256xf32>
      %c0_20 = arith.constant 0 : index
      %c0_21 = arith.constant 0 : index
      %36 = vector.load %arg7[%c0_20, %c0_21] : memref<1x256xf32, #tpu.memory_space<vmem>>, vector<1x256xf32>
      %37 = vector.broadcast %36 : vector<1x256xf32> to vector<8x256xf32>
      %38 = arith.addf %35, %37 : vector<8x256xf32>
      %cst_22 = arith.constant 0.000000e+00 : f32
      %39 = vector.broadcast %cst_22 : f32 to vector<8x256xf32>
      %40 = arith.maximumf %38, %39 : vector<8x256xf32>
      %c0_23 = arith.constant 0 : index
      %c0_24 = arith.constant 0 : index
      %41 = vector.load %arg8[%c0_23, %c0_24] : memref<256x128xf32, #tpu.memory_space<vmem>>, vector<256x128xf32>
      %cst_25 = arith.constant dense<0.000000e+00> : vector<8x128xf32>
      %42 = tpu.matmul %40, %41, %cst_25 {dimension_numbers = #tpu.dot_dimension_numbers<[1], [0], [0], [1], [0, 0, 1, 1], [], []>} : vector<8x256xf32>, vector<256x128xf32>, vector<8x128xf32> -> vector<8x128xf32>
      %c0_26 = arith.constant 0 : index
      %c0_27 = arith.constant 0 : index
      %43 = vector.load %arg9[%c0_26, %c0_27] : memref<1x128xf32, #tpu.memory_space<vmem>>, vector<1x128xf32>
      %44 = vector.broadcast %43 : vector<1x128xf32> to vector<8x128xf32>
      %45 = arith.addf %42, %44 : vector<8x128xf32>
      %c0_28 = arith.constant 0 : index
      %c0_29 = arith.constant 0 : index
      %46 = vector.load %arg10[%c0_28, %c0_29] : memref<8x128xf32, #tpu.memory_space<vmem>>, vector<8x128xf32>
      tpu.vector_store %arg10[%c0_28, %c0_29], %45 {strides = array<i32>} : memref<8x128xf32, #tpu.memory_space<vmem>>, vector<8x128xf32>,
    } else {
    }
    return
  }
  func.func @transform_0(%arg0: i32, %arg1: i32) -> (i32, i32) {
    %c0_i32 = arith.constant 0 : i32
    return %arg0, %arg1 : i32, i32
  }
  func.func @transform_1(%arg0: i32, %arg1: i32) -> (i32, i32) {
    %c0_i32 = arith.constant 0 : i32
    %c0_i32_0 = arith.constant 0 : i32
    %c0_i32_1 = arith.constant 0 : i32
    return %c0_i32, %c0_i32_0 : i32, i32
  }
  func.func @transform_2(%arg0: i32, %arg1: i32) -> (i32, i32) {
    %c0_i32 = arith.constant 0 : i32
    %c0_i32_0 = arith.constant 0 : i32
    %c0_i32_1 = arith.constant 0 : i32
    return %c0_i32, %c0_i32_0 : i32, i32
  }
  func.func @transform_3(%arg0: i32, %arg1: i32) -> (i32, i32) {
    %c0_i32 = arith.constant 0 : i32
    %c0_i32_0 = arith.constant 0 : i32
    %c0_i32_1 = arith.constant 0 : i32
    return %c0_i32, %c0_i32_0 : i32, i32
  }
  func.func @transform_4(%arg0: i32, %arg1: i32) -> (i32, i32) {
    %c0_i32 = arith.constant 0 : i32
    %c0_i32_0 = arith.constant 0 : i32
    %c0_i32_1 = arith.constant 0 : i32
    return %c0_i32, %c0_i32_0 : i32, i32
  }
  func.func @transform_5(%arg0: i32, %arg1: i32) -> (i32, i32) {
    %c0_i32 = arith.constant 0 : i32
    %c0_i32_0 = arith.constant 0 : i32
    %c0_i32_1 = arith.constant 0 : i32
    return %c0_i32, %c0_i32_0 : i32, i32
  }
  func.func @transform_6(%arg0: i32, %arg1: i32) -> (i32, i32) {
    %c0_i32 = arith.constant 0 : i32
    %c0_i32_0 = arith.constant 0 : i32
    %c0_i32_1 = arith.constant 0 : i32
    return %c0_i32, %c0_i32_0 : i32, i32
  }
  func.func @transform_7(%arg0: i32, %arg1: i32) -> (i32, i32) {
    %c0_i32 = arith.constant 0 : i32
    %c0_i32_0 = arith.constant 0 : i32
    %c0_i32_1 = arith.constant 0 : i32
    return %c0_i32, %c0_i32_0 : i32, i32
  }
  func.func @transform_8(%arg0: i32, %arg1: i32) -> (i32, i32) {
    %c0_i32 = arith.constant 0 : i32
    %c0_i32_0 = arith.constant 0 : i32
    return %arg0, %c0_i32 : i32, i32
  }
}

</mosaic_0001>

<bundles_post_ra>
// kernel: tpu_custom_call.1
= control target key start
LH: loop header
LB: loop body
LE: loop exit
PB: predicated region body
PF: predicated region fallthrough
CT: control target
= control target key end

     0   :  { %s2069_s0 = inlined_call_operand.hbm [shape: f32[30,160], index: 0, kind: input, shape index: {}]   ;;  %s2070_s1 = inlined_call_operand.hbm [shape: f32[8,24], index: 1, kind: input, shape index: {}]   ;;  %s2071_s2 = inlined_call_operand.hbm [shape: f32[24,512], index: 2, kind: input, shape index: {}]   ;;  %s2072_s3 = inlined_call_operand.vmem [shape: f32[1,512], index: 3, kind: input, shape index: {}]   ;;  %s2073_s4 = inlined_call_operand.hbm [shape: f32[512,256], index: 4, kind: input, shape index: {}]   ;;  %s2074_s5 = inlined_call_operand.vmem [shape: f32[1,256], index: 5, kind: input, shape index: {}]   ;;  %s2075_s6 = inlined_call_operand.hbm [shape: f32[256,128], index: 6, kind: input, shape index: {}]   ;;  %s2076_s7 = inlined_call_operand.vmem [shape: f32[1,128], index: 7, kind: input, shape index: {}]   ;;  %s2077_s8 = inlined_call_operand.hbm [shape: f32[10,128], index: 8, kind: output, shape index: {}]  }
   0x1   :  { %2087 = sst [smem:[#allocation22_spill]] %s2070_s1 }
   0x2   :  { %2088 = sst [smem:[#allocation23_spill]] %s2071_s2 }
   0x3   :  { %2089 = sst [smem:[#allocation24_spill]] %s2074_s5 }
   0x4   :  { %2090 = sst [smem:[#allocation25_spill]] %s2076_s7 }
   0x5   :  { %2091 = sst [smem:[#allocation26_spill]] %s2077_s8 }
   0x6   :  { %13 = vsyncpa [#allocation4], 0 }
   0x7   :  { %15 = vsyncpa [#allocation4 + $0x1], 0 }
   0x8   :  { %16 = vsyncpa [#allocation7], 0 }
   0x9   :  { %17 = vsyncpa [#allocation10], 0 }
   0xa   :  { %18 = vsyncpa [#allocation5], 0 }
   0xb   :  { %20 = vsyncpa [#allocation5 + $0x1], 0  ;;  %s1749_s27 = smov 0   ;;  %s1751_s28 = smov 0  }
   0xc   :  { %s1753_s29 = smov 0   ;;  %s1755_s30 = smov 0  }
   0xd   :  { %s1757_s9 = smov 0   ;;  %s1759_s10 = smov 0  }
   0xe   :  { %s1761_s11 = smov 0   ;;  %s1763_s12 = smov 0  }
   0xf   :  { %s1765_s13 = smov 0   ;;  %s1767_s14 = smov 0  }
  0x10   :  { %s1769_s15 = smov 0  }
  0x11 LB: > { %2092 = sst [smem:[#allocation17_spill]] %s1653_s29  ;;  %s1209_s16 = sadd.s32 4294967295, %s1685_s15   ;;  %s1685_s15 = sphi %s1769_s15, %s26_s15   ;;  %s1681_s14 = sphi %s1767_s14, %s2128_s14   ;;  %s1677_s13 = sphi %s1765_s13, %s2127_s13   ;;  %s1673_s12 = sphi %s1763_s12, %s2126_s12   ;;  %s1669_s11 = sphi %s1761_s11, %s2125_s11   ;;  %s1665_s10 = sphi %s1759_s10, %s2124_s10   ;;  %s1661_s9 = sphi %s1757_s9, %s2123_s9   ;;  %s1657_s30 = sphi %s1755_s30, %s2122_s30   ;;  %s1653_s29 = sphi %s1753_s29, %s2116_s29   ;;  %s1649_s28 = sphi %s1751_s28, %s2121_s28   ;;  %s1645_s27 = sphi %s1749_s27, %s2120_s27  }
  0x12   : > { %s1210_s17 = sadd.s32 4294967294, %s1685_s15   ;;  %s35_s18 = sadd.s32 1, %s1677_s13 }
  0x13   : > { %s38_s19 = sadd.s32 1, %s1681_s14  ;;  %p36_p0 = scmp.ge.s32.totalorder %s35_s18, 2 }
  0x14   : > { %s47_s20 = sadd.s32 1, %s1665_s10  ;;  %p54_p1 = scmp.ne.s32.totalorder %s1665_s10, %s1661_s9 }
  0x15   : > { %p55_p2 = scmp.eq.s32.totalorder %s1685_s15, 0  ;;  %s2130_s18 = smov (%p36_p0, %s35_s18), 0 }
  0x16   : > { %2093 = sst [smem:[#allocation18_spill]] %s2130_s18  ;;  %s2132_s19 = smov (!%p36_p0, %s38_s19), %s1681_s14 }
  0x17   : > { %s43_s21 = ssub.s32 %s1677_s13, %s2130_s18  ;;  %p1815_p3 = por %p55_p2, %p54_p1 }
  0x18   : > { %p40_p4 = scmp.ge.s32.totalorder %s2132_s19, 2  ;;  %p60_p5 = scmp.ne.s32.totalorder %s1661_s9, %s1657_s30 }
  0x19   : > { %s2094_s22 = scalar_select %p1815_p3, 1, 0 }
  0x1a   : > { %p1820_p6 = scmp.eq.s32.totalorder %s1209_s16, 0  ;;  %s220_s24 = sadd.s32 1, %s1653_s29 }
  0x1b   : > { %s2134_s19 = smov (%p40_p4, %s2132_s19), 0  ;;  %p230_p8 = scmp.ne.s32.totalorder %s1653_s29, %s1649_s28 }
  0x1c   : > { %s2095_s23 = scalar_select %p1820_p6, 1, 0 }
  0x1d   : > { %2096 = sst [smem:[#allocation19_spill]] %s2134_s19  ;;  %p1829_p7 = por %p1820_p6, %p60_p5 }
  0x1e   : > { %s42_s26 = ssub.s32 %s1681_s14, %s2134_s19  ;;  %p231_p9 = scmp.eq.s32.totalorder %s1209_s16, 3 }
  0x1f   : > { %s2097_s25 = scalar_select %p1829_p7, 1, 0 }
  0x20   : > { %s44_s30 = sor.u32 %s43_s21, %s42_s26  ;;  %p218_p10 = scmp.eq.s32.totalorder %s42_s26, 0 }
  0x21   : > { %p45_p11 = scmp.eq.s32.totalorder %s44_s30, 0  ;;  %p1837_p12 = por %p231_p9, %p230_p8 }
  0x22   : > { %s1842_s8 = scalar_select %p218_p10, %s1653_s29, %s220_s24  }
  0x23   : > { %s2098_s18 = scalar_select %p1837_p12, 1, 0 }
  0x24   : > { %2099 = sst [smem:[#allocation20_spill]] %s1842_s8  ;;  %p236_p13 = scmp.ne.s32.totalorder %s1649_s28, %s1645_s27 }
  0x25   : > { %s1845_s7 = scalar_select %p45_p11, %s1665_s10, %s47_s20  }
  0x26   : > { %p237_p0 = scmp.eq.s32.totalorder %s1210_s17, 3  ;;  %p1211_p1 = scmp.ge.s32.totalorder %s1685_s15, 1 }
  0x27   : > { %2100 = sst [smem:[#allocation21_spill]] %s1845_s7  ;;  %p244_p2 = scmp.lt.s32.totalorder %s1685_s15, 5 }
  0x28   : > { %p1851_p4 = por %p237_p0, %p236_p13  ;;  %s1687_s21 = smov [#allocation6]  }
  0x29   : > { %p1855_p5 = pnand %p1211_p1, %p244_p2  ;;  %s257_s26 = sshll.u32 %s1687_s21, 4  ;;  %s258_s26 = int_to_ptr.vmem [resolvable:$true] %s257_s26 }
  0x2a   : > { %s2101_s5 = scalar_select %p1851_p4, 1, 0 }
  0x2b   : > { %s2102_s16 = scalar_select %p1855_p5, 1, 0 }
  0x2c   : > { %p1298_p8 = pneg %p1855_p5  ;;  %s1688_s20 = smov [#allocation9]  }
  0x2d   : > { %s283_s24 = sshll.u32 %s1688_s20, 4  ;;  %s1689_s30 = smov [#allocation8]   ;;  %s284_s24 = int_to_ptr.vmem [resolvable:$true] %s283_s24 }
  0x2e   : > { %p1863_p9 = pnand %p1298_p8, %p1820_p6  ;;  %s267_s19 = sshll.u32 %s1689_s30, 4  ;;  %s268_s19 = int_to_ptr.vmem [resolvable:$true] %s267_s19 }
  0x2f   : > { %s1438_s7 = scalar_lea.vmem %s258_s26, 128  ;;  %p1446_p1 = scmp.lt.s32.totalorder %s258_s26, %s258_s26 }
  0x30   : > { %p1429_p10 = pneg %p1863_p9  ;;  %p1439_p11 = scmp.ne.s32.totalorder %s258_s26, %s1438_s7 }
  0x31   : > { %p1447_p2 = scmp.lt.s32.totalorder %s1438_s7, %s1438_s7 }
  0x32   : > { %p1441_p13 = pnand %p1439_p11, %p1429_p10 }
  0x33   : > { %p1448_p4 = por %p1447_p2, %p1446_p1 }
  0x34   : > { %p1442_p0 = pneg %p1441_p13 }
  0x36   : > { %p1449_p8 = pnand %p1448_p4, %p1442_p0 }
  0x38   : > { %1452 = shalt.err (!%p1449_p8)
}
  0x39   : > { %s2104_s1 = sld [smem:[#allocation22_spill]]  ;;  %s1464_s30 = scalar_lea.vmem %s284_s24, 16384 }
  0x3a   : > { %p1465_p12 = scmp.ne.s32.totalorder %s284_s24, %s1464_s30  ;;  %p1472_p11 = scmp.lt.s32.totalorder %s284_s24, %s284_s24 }
  0x3b   : > { %p1473_p13 = scmp.lt.s32.totalorder %s1464_s30, %s1464_s30 }
  0x3c   : > { %p1467_p6 = pnand %p1465_p12, %p1429_p10 }
  0x3d   : > { %p1474_p5 = por %p1473_p13, %p1472_p11 }
  0x3e   : > { %p1468_p7 = pneg %p1467_p6 }
  0x3f   : > { %1301 = dma.hbm_to_vmem [thread:$0]  (!%p1863_p9), %s2104_s1, 128, %s258_s26, [#allocation7]  }
  0x40   : > { %p1475_p3 = pnand %p1474_p5, %p1468_p7 }
  0x42   : > { %1478 = shalt.err (!%p1475_p3)
}
  0x43   : > { %s1690_s7 = smov 256   ;;  %s1691_s8 = smov 16  }
  0x44   : > { %1307 = dma.hbm_to_vmem [thread:$0]  (!%p1863_p9), %s2073_s4, 16384, %s284_s24, [#allocation10], %s1690_s7, %s1690_s7, %s1691_s8  }
  0x45   : > { %s1490_s26 = scalar_lea.vmem %s268_s19, 1536  ;;  %p1498_p0 = scmp.lt.s32.totalorder %s268_s19, %s268_s19 }
  0x46   : > { %p1491_p4 = scmp.ne.s32.totalorder %s268_s19, %s1490_s26  ;;  %p1499_p1 = scmp.lt.s32.totalorder %s1490_s26, %s1490_s26 }
  0x48   : > { %p1493_p6 = pnand %p1491_p4, %p1429_p10  ;;  %p1500_p7 = por %p1499_p1, %p1498_p0 }
  0x4a   : > { %p1494_p12 = pneg %p1493_p6 }
  0x4c   : > { %p1501_p3 = pnand %p1500_p7, %p1494_p12 }
  0x4e   : > { %1504 = shalt.err (!%p1501_p3)
}
  0x4f   : > { %s1692_s20 = smov 512   ;;  %s1693_s30 = smov 32  }
  0x50   : > { %s2105_s2 = sld [smem:[#allocation23_spill]]  ;;  %s1694_s8 = smov [#allocation11]  }
  0x51   : > { %s299_s24 = sshll.u32 %s1694_s8, 4  ;;  %s300_s24 = int_to_ptr.vmem [resolvable:$true] %s299_s24 }
  0x52   : > { %s1516_s7 = scalar_lea.vmem %s300_s24, 4096  ;;  %p1524_p11 = scmp.lt.s32.totalorder %s300_s24, %s300_s24 }
  0x53   : > { %p1517_p5 = scmp.ne.s32.totalorder %s300_s24, %s1516_s7  ;;  %p1525_p13 = scmp.lt.s32.totalorder %s1516_s7, %s1516_s7 }
  0x55   : > { %p1519_p2 = pnand %p1517_p5, %p1429_p10  ;;  %p1526_p4 = por %p1525_p13, %p1524_p11 }
  0x56   : > { %1304 = dma.hbm_to_vmem [thread:$0]  (!%p1863_p9), %s2105_s2, 1536, %s268_s19, [#allocation7], %s1692_s20, %s1692_s20, %s1693_s30  }
  0x57   : > { %p1520_p8 = pneg %p1519_p2 }
  0x59   : > { %p1527_p6 = pnand %p1526_p4, %p1520_p8 }
  0x5b   : > { %1530 = shalt.err (!%p1527_p6)
}
  0x5c   : > { %s1695_s21 = smov 128   ;;  %s1696_s26 = smov 8  }
  0x5d   : > { %1310 = dma.hbm_to_vmem [thread:$0]  (!%p1863_p9), %s2075_s6, 4096, %s300_s24, [#allocation10], %s1695_s21, %s1695_s21, %s1696_s26  }
  0x5e   : > { %p1216_p12 = scmp.ge.s32.totalorder %s1685_s15, 4 }
  0x5f   : > { %p2106_p0 = scmp.ne.s32.totalorder (!%p1216_p12), %s2094_s22, 0 }
  0x60   : > { %312 = sbr.rel (%p1216_p12) target bundleno = 138 (0x8a), region = 44 }
  0x65   : > { %315 = sbr.rel (!%p2106_p0) target bundleno = 138 (0x8a), region = 48  ;;  %s316_s20 = sand.u32 (%p2106_p0), 1, %s1665_s10  }
  0x66   : > { %s321_s30 = smul.u32 (%p2106_p0), 3, %s1681_s14  ;;  %s1909_s1 = scalar_lea.sflag (%p2106_p0), [#allocation4], %s316_s20 }
  0x67   : > { %s1277_s29 = smul.u32 (%p2106_p0), 24, %s316_s20 }
  0x68   : > { %s322_s8 = ssub.s32 (%p2106_p0), 4, %s321_s30 }
  0x69   : > { %p323_p10 = scmp.lt.s32.totalorder (%p2106_p0), %s322_s8, 3  ;;  %s320_s24 = scalar_lea.vmem (%p2106_p0), [#allocation3], %s1277_s29 }
  0x6b   : > { %s2136_s8 = smov (!%p323_p10, %s322_s8), 3 }
  0x6c   : > { %s1906_s7 = sshll.u32 %s2136_s8, 7 }
  0x6d   : > { %s327_s17 = ssub.s32 384, %s1906_s7 }
  0x6e   : > { %328 = vsyncadd %s1909_s1, %s327_s17  ;;  %p1218_p9 = scmp.ne.s32.totalorder %s1906_s7, 0  ;;  %s1241_s22 = smul.u32 6, %s1681_s14 }
  0x6f   : > { %s335_s21 = sshll.u32 %s320_s24, 4  ;;  %s1535_s24 = scalar_lea.hbm %s2069_s0, 1024  ;;  %s1915_s21 = int_to_ptr.vmem [resolvable:$true] %s335_s21 }
  0x70   : > { %s331_s26 = sadd.s32 %s1677_s13, %s1241_s22 }
  0x71   : > { %s1220_s19 = sshll.u32 %s331_s26, 7 }
  0x72   : > { %s1920_s20 = scalar_lea.hbm %s2069_s0, %s1220_s19 }
  0x73   : > { %s1531_s29 = scalar_lea.hbm %s1920_s20, %s1906_s7 }
  0x74   : > { %p1532_p1 = scmp.ne.s32.totalorder %s1920_s20, %s1531_s29  ;;  %p1537_p5 = scmp.lt.s32.totalorder %s1535_s24, %s1531_s29 }
  0x76   : > { %p1533_p7 = pnand %p1532_p1, %p1218_p9 }
  0x78   : > { %p1534_p3 = pneg %p1533_p7 }
  0x7a   : > { %p1539_p2 = pnand %p1537_p5, %p1534_p3 }
  0x7c   : > { %1542 = shalt.err (!%p1539_p2)
}
  0x7d   : > { %s1543_s22 = scalar_lea.vmem %s1915_s21, %s1906_s7  ;;  %s1697_s26 = smov [#allocation3]  }
  0x7e   : > { %p1544_p8 = scmp.ne.s32.totalorder %s1915_s21, %s1543_s22  ;;  %s1547_s19 = sshll.u32 %s1697_s26, 4  ;;  %s1548_s19 = int_to_ptr.vmem [resolvable:$false] %s1547_s19 }
  0x7f   : > { %s1549_s30 = scalar_lea.vmem %s1548_s19, 768  ;;  %p1550_p4 = scmp.lt.s32.totalorder %s1915_s21, %s1548_s19 }
  0x80   : > { %p1545_p11 = pnand %p1544_p8, %p1218_p9  ;;  %p1551_p6 = scmp.lt.s32.totalorder %s1549_s30, %s1543_s22 }
  0x82   : > { %p1546_p13 = pneg %p1545_p11  ;;  %p1552_p12 = por %p1551_p6, %p1550_p4 }
  0x84   : > { %p1553_p0 = pnand %p1552_p12, %p1546_p13 }
  0x86   : > { %1556 = shalt.err (!%p1553_p0)
}
  0x87   : > { %s1698_s2 = smov 256   ;;  %s1699_s8 = smov 128  }
  0x88   : > { %s1700_s29 = smov 8  }
  0x89   : > { %341 = dma.hbm_to_vmem [thread:$0]  (%p1218_p9), %s1920_s20, %s1906_s7, %s1915_s21, %s1909_s1, %s1698_s2, %s1699_s8, %s1700_s29  }
  0x8a PF: > { %p2107_p10 = scmp.ne.s32.totalorder %s2102_s16, 0 }
  0x8b   : > { %s349_s17 = sand.u32 (!%p2107_p10), 1, %s1661_s9   ;;  %p2108_p1 = scmp.ne.s32.totalorder (!%p2107_p10), %s2097_s25, 0 }
  0x8c   : > { %347 = sbr.rel (%p2107_p10) target bundleno = 985 (0x3d9), region = 52  ;;  %s350_s22 = scalar_lea.sflag (!%p2107_p10), [#allocation4], %s349_s17 }
  0x8d   : > { %s1278_s24 = smul.u32 (!%p2107_p10), 24, %s349_s17 }
  0x8f   : > { %s1945_s26 = scalar_lea.vmem (!%p2107_p10), [#allocation3], %s1278_s24 }
  0x91   : > { %1628 = dma.done.wait (%p2108_p1), %s350_s22, 384  }
  0x92   : > { %1630 = vsyncadd (%p2108_p1), %s350_s22, 4294966912  ;;  %p2109_p7 = scmp.ne.s32.totalorder %s2095_s23, 0 }
  0x94   : > { %1632 = dma.done.wait (%p2109_p7), [#allocation7], 1664  }
  0x95   : > { %1634 = vsyncadd (%p2109_p7), [#allocation7], 4294965632 }
  0x96   : > { %1636 = dma.done.wait (%p2109_p7), [#allocation10], 20480  }
  0x97   : > { %1638 = vsyncadd (%p2109_p7), [#allocation10], 4294946816  ;;  %s399_s16 = sand.u32 1, %s1649_s28   ;;  %p1229_p9 = scmp.ne.s32.totalorder %s1669_s11, 0 }
  0x98   : > { %s1962_s7 = sshll.u32 %s399_s16, 3 }
  0x99   : > { %s401_s25 = scalar_lea.vmem [#allocation12], %s1962_s7  ;;  %410 = sbr.rel (%p1229_p9) target bundleno = 161 (0xa1), region = 76 }
  0x9e   : > { %v1701_v0 = vmov 0.0  }
  0x9f   : > { %411 = vst [vmem:[#allocation2 + $0x10] sm:$0xff] %v1701_v0  ;;  %412 = vst [vmem:[#allocation2] sm:$0xff] %v1701_v0 }
  0xa0   : > { %413 = vst [vmem:[#allocation2 + $0x8] sm:$0xff] %v1701_v0 }
  0xa1 PF: > { %p1230_p3 = scmp.ne.s32.totalorder %s1669_s11, 1 }
  0xa2   : > { %s1231_s23 = sshll.u32 (!%p1230_p3), %s1669_s11, 7 }
  0xa3   : > { %417 = sbr.rel (%p1230_p3) target bundleno = 178 (0xb2), region = 80  ;;  %s424_s1 = ssub.s32 (!%p1230_p3), 160, %s1231_s23 }
  0xa8   : > { %v421_v1 = vlaneseq  ;;  %v425_v3 = vld [vmem:[%s1945_s26] sm:$0xff]  ;;  %v428_v4 = vstv %s424_s1  ;;  %v426_v5 = vld [vmem:[%s1945_s26 + $0x8] sm:$0xff]  ;;  %v427_v6 = vld [vmem:[%s1945_s26 + $0x10] sm:$0xff] }
  0xa9   : > { %v418_v7 = vld [vmem:[#allocation2 + $0x10] sm:$0xff]  ;;  %v419_v8 = vld [vmem:[#allocation2] sm:$0xff]  ;;  %v420_v9 = vld [vmem:[#allocation2 + $0x8] sm:$0xff] }
  0xaa   : > { %v422_v2 = vand.u32 127, %v421_v1 }
  0xac   : > { %vm429_vm0 = vcmp.lt.s32.totalorder %v422_v2, %v428_v4 }
  0xad   : > { %v430_v10 = vsel %vm429_vm0, %v425_v3, 0.0  ;;  %v431_v11 = vsel %vm429_vm0, %v426_v5, 0.0  ;;  %v432_v12 = vsel %vm429_vm0, %v427_v6, 0.0 }
  0xae   : > { %v433_v13 = vadd.f32 %v430_v10, %v418_v7  ;;  %v434_v14 = vadd.f32 %v431_v11, %v419_v8  ;;  %v435_v15 = vadd.f32 %v432_v12, %v420_v9 }
  0xb0   : > { %436 = vst [vmem:[#allocation2 + $0x10] sm:$0xff] %v433_v13  ;;  %437 = vst [vmem:[#allocation2] sm:$0xff] %v434_v14 }
  0xb1   : > { %438 = vst [vmem:[#allocation2 + $0x8] sm:$0xff] %v435_v15 }
  0xb2 PF: > { %p1232_p5 = scmp.eq.s32.totalorder %s1669_s11, 1 }
  0xb4   : > { %442 = sbr.rel (%p1232_p5) target bundleno = 191 (0xbf), region = 84 }
  0xb9   : > { %v443_v16 = vld [vmem:[#allocation2 + $0x10] sm:$0xff]  ;;  %v444_v18 = vld [vmem:[#allocation2] sm:$0xff]  ;;  %v445_v21 = vld [vmem:[#allocation2 + $0x8] sm:$0xff] }
  0xba   : > { %v446_v17 = vld [vmem:[%s1945_s26] sm:$0xff]  ;;  %v447_v20 = vld [vmem:[%s1945_s26 + $0x8] sm:$0xff]  ;;  %v448_v22 = vld [vmem:[%s1945_s26 + $0x10] sm:$0xff] }
  0xbb   : > { %v449_v19 = vadd.f32 %v446_v17, %v443_v16  ;;  %v450_v23 = vadd.f32 %v447_v20, %v444_v18  ;;  %v451_v24 = vadd.f32 %v448_v22, %v445_v21 }
  0xbd   : > { %452 = vst [vmem:[#allocation2 + $0x10] sm:$0xff] %v449_v19  ;;  %453 = vst [vmem:[#allocation2] sm:$0xff] %v450_v23 }
  0xbe   : > { %454 = vst [vmem:[#allocation2 + $0x8] sm:$0xff] %v451_v24 }
  0xbf PF: > { %457 = sbr.rel (%p1230_p3) target bundleno = 960 (0x3c0), region = 88  ;;  %s2110_s8 = sld [smem:[#allocation24_spill]] (!%p1230_p3) }
  0xc0   : > { %s462_s21 = smul.u32 (!%p1230_p3), 24, %s1673_s12  ;;  %s2111_s24 = sld [smem:[#allocation25_spill]] (!%p1230_p3) }
  0xc2   : > { %s463_s20 = ssub.s32 (!%p1230_p3), 30, %s462_s21 }
  0xc4   : > { %v458_v25 = vlaneseq  ;;  %v468_v27 = vld [vmem:[#allocation2 + $0x10] sm:$0xff]  ;;  %v464_v28 = vstv %s463_s20  ;;  %v469_v33 = vld [vmem:[#allocation2] sm:$0xff]  ;;  %v1702_v36 = vmov 0.0   ;;  %v711_v37 = vld [vmem:[#allocation9 + $0xf8] sm:$0xff]  ;;  %vm530_vm4 = vcmask 195584  }
  0xc5   : > { %v470_v30 = vld [vmem:[#allocation2 + $0x8] sm:$0xff]  ;;  %598 = vmatprep.mubr.f32.mxu1 %v1702_v36  ;;  %v710_v38 = vld [vmem:[#allocation9 + $0xf0] sm:$0xff]  ;;  %v709_v39 = vld [vmem:[#allocation9 + $0xe8] sm:$0xff]  ;;  %820 = vmatprep.subr.mxu0 %v711_v37 }
  0xc6   : > { %v1980_v26 = vshrl.u32 %v458_v25, 7  ;;  %v708_v40 = vld [vmem:[#allocation9 + $0xe0] sm:$0xff]  ;;  %821 = vmatpush1.msra.mxu0 %v710_v38  ;;  %v707_v41 = vld [vmem:[#allocation9 + $0xd8] sm:$0xff]  ;;  %v706_v42 = vld [vmem:[#allocation9 + $0xd0] sm:$0xff] }
  0xc7   : > { %822 = vmatprep.subr.mxu0 %v709_v39  ;;  %v705_v43 = vld [vmem:[#allocation9 + $0xc8] sm:$0xff]  ;;  %v704_v44 = vld [vmem:[#allocation9 + $0xc0] sm:$0xff]  ;;  %v703_v45 = vld [vmem:[#allocation9 + $0xb8] sm:$0xff] }
  0xc8   : > { %v461_v29 = vadd.s32 16, %v1980_v26  ;;  %v460_v31 = vadd.s32 8, %v1980_v26  ;;  %vm465_vm1 = vcmp.lt.s32.totalorder %v1980_v26, %v464_v28  ;;  %823 = vmatpush1.msra.mxu0 %v708_v40  ;;  %v702_v46 = vld [vmem:[#allocation9 + $0xb0] sm:$0xff]  ;;  %v701_v47 = vld [vmem:[#allocation9 + $0xa8] sm:$0xff]  ;;  %v700_v48 = vld [vmem:[#allocation9 + $0xa0] sm:$0xff] }
  0xc9   : > { %v471_v32 = vsel %vm465_vm1, %v468_v27, 0.0  ;;  %824 = vmatprep.subr.mxu0 %v707_v41  ;;  %v699_v49 = vld [vmem:[#allocation9 + $0x98] sm:$0xff]  ;;  %v698_v50 = vld [vmem:[#allocation9 + $0x90] sm:$0xff]  ;;  %v697_v51 = vld [vmem:[#allocation9 + $0x88] sm:$0xff] }
  0xca   : > { %vm467_vm2 = vcmp.lt.s32.totalorder %v461_v29, %v464_v28  ;;  %vm466_vm3 = vcmp.lt.s32.totalorder %v460_v31, %v464_v28  ;;  %474 = vadd.xlane.f32.xlu1 %v471_v32  ;;  %825 = vmatpush1.msra.mxu0 %v706_v42  ;;  %v696_v52 = vld [vmem:[#allocation9 + $0x80] sm:$0xff]  ;;  %v695_v53 = vld [vmem:[#allocation9 + $0x78] sm:$0xff]  ;;  %v694_v54 = vld [vmem:[#allocation9 + $0x70] sm:$0xff] }
  0xcb   : > { %v473_v34 = vsel %vm467_vm2, %v470_v30, 0.0  ;;  %v472_v35 = vsel %vm466_vm3, %v469_v33, 0.0  ;;  %826 = vmatprep.subr.mxu0 %v705_v43  ;;  %v693_v55 = vld [vmem:[#allocation9 + $0x68] sm:$0xff]  ;;  %v692_v56 = vld [vmem:[#allocation9 + $0x60] sm:$0xff]  ;;  %v691_v57 = vld [vmem:[#allocation9 + $0x58] sm:$0xff] }
  0xcc   : > { %478 = vadd.xlane.f32.xlu0 %v473_v34  ;;  %827 = vmatpush1.msra.mxu0 %v704_v44  ;;  %v690_v58 = vld [vmem:[#allocation9 + $0x50] sm:$0xff]  ;;  %v689_v59 = vld [vmem:[#allocation9 + $0x48] sm:$0xff]  ;;  %v688_v60 = vld [vmem:[#allocation9 + $0x40] sm:$0xff] }
  0xcd   : > { %828 = vmatprep.subr.mxu0 %v703_v45  ;;  %v687_v61 = vld [vmem:[#allocation9 + $0x38] sm:$0xff]  ;;  %v686_v62 = vld [vmem:[#allocation9 + $0x30] sm:$0xff]  ;;  %v685_v63 = vld [vmem:[#allocation9 + $0x28] sm:$0xff] }
  0xce   : > { %829 = vmatpush1.msra.mxu0 %v702_v46  ;;  %v684_v0 = vld [vmem:[#allocation9 + $0x20] sm:$0xff]  ;;  %v683_v1 = vld [vmem:[#allocation9 + $0x18] sm:$0xff]  ;;  %v682_v2 = vld [vmem:[#allocation9 + $0x10] sm:$0xff] }
  0xcf   : > { %830 = vmatprep.subr.mxu0 %v701_v47  ;;  %v681_v3 = vld [vmem:[#allocation9 + $0x8] sm:$0xff]  ;;  %v680_v4 = vld [vmem:[#allocation9] sm:$0xff]  ;;  %v743_v5 = vld [vmem:[#allocation9 + $0x1f8] sm:$0xff] }
  0xd0   : > { %476 = vadd.xlane.f32.xlu0 %v472_v35  ;;  %831 = vmatpush1.msra.mxu0 %v700_v48  ;;  %v742_v6 = vld [vmem:[#allocation9 + $0x1f0] sm:$0xff]  ;;  %v741_v7 = vld [vmem:[#allocation9 + $0x1e8] sm:$0xff]  ;;  %v740_v8 = vld [vmem:[#allocation9 + $0x1e0] sm:$0xff] }
  0xd1   : > { %832 = vmatprep.subr.mxu0 %v699_v49  ;;  %v739_v9 = vld [vmem:[#allocation9 + $0x1d8] sm:$0xff]  ;;  %v738_v10 = vld [vmem:[#allocation9 + $0x1d0] sm:$0xff]  ;;  %v737_v11 = vld [vmem:[#allocation9 + $0x1c8] sm:$0xff] }
  0xd2   : > { %833 = vmatpush1.msra.mxu0 %v698_v50  ;;  %v736_v12 = vld [vmem:[#allocation9 + $0x1c0] sm:$0xff]  ;;  %v735_v13 = vld [vmem:[#allocation9 + $0x1b8] sm:$0xff]  ;;  %v734_v14 = vld [vmem:[#allocation9 + $0x1b0] sm:$0xff] }
  0xd3   : > { %834 = vmatprep.subr.mxu0 %v697_v51  ;;  %v733_v15 = vld [vmem:[#allocation9 + $0x1a8] sm:$0xff]  ;;  %v732_v16 = vld [vmem:[#allocation9 + $0x1a0] sm:$0xff]  ;;  %v731_v17 = vld [vmem:[#allocation9 + $0x198] sm:$0xff] }
  0xd4   : > { %835 = vmatpush1.msra.mxu0 %v696_v52  ;;  %v730_v18 = vld [vmem:[#allocation9 + $0x190] sm:$0xff]  ;;  %v729_v19 = vld [vmem:[#allocation9 + $0x188] sm:$0xff]  ;;  %v728_v20 = vld [vmem:[#allocation9 + $0x180] sm:$0xff] }
  0xd5   : > { %836 = vmatprep.subr.mxu0 %v695_v53  ;;  %v727_v21 = vld [vmem:[#allocation9 + $0x178] sm:$0xff]  ;;  %v726_v22 = vld [vmem:[#allocation9 + $0x170] sm:$0xff]  ;;  %v725_v23 = vld [vmem:[#allocation9 + $0x168] sm:$0xff] }
  0xd6   : > { %837 = vmatpush1.msra.mxu0 %v694_v54  ;;  %v724_v24 = vld [vmem:[#allocation9 + $0x160] sm:$0xff]  ;;  %v723_v25 = vld [vmem:[#allocation9 + $0x158] sm:$0xff]  ;;  %v722_v27 = vld [vmem:[#allocation9 + $0x150] sm:$0xff] }
  0xd7   : > { %838 = vmatprep.subr.mxu0 %v693_v55  ;;  %v721_v28 = vld [vmem:[#allocation9 + $0x148] sm:$0xff]  ;;  %v720_v29 = vld [vmem:[#allocation9 + $0x140] sm:$0xff]  ;;  %v495_v49 = vld [vmem:[#allocation8 + $0x58] sm:$0xff] }
  0xd8   : > { %839 = vmatpush1.msra.mxu0 %v692_v56  ;;  %v493_v31 = vld [vmem:[#allocation8 + $0x48] sm:$0xff]  ;;  %v492_v33 = vld [vmem:[#allocation8 + $0x40] sm:$0xff]  ;;  %v494_v50 = vld [vmem:[#allocation8 + $0x50] sm:$0xff] }
  0xd9   : > { %840 = vmatprep.subr.mxu0 %v691_v57  ;;  %v489_v40 = vld [vmem:[#allocation8 + $0x28] sm:$0xff]  ;;  %v488_v41 = vld [vmem:[#allocation8 + $0x20] sm:$0xff]  ;;  %v483_v51 = vld [vmem:[#allocation6] sm:$0xff] }
  0xda   : > { %841 = vmatpush1.msra.mxu0 %v690_v58  ;;  %v485_v42 = vld [vmem:[#allocation8 + $0x8] sm:$0xff]  ;;  %v484_v44 = vld [vmem:[#allocation8] sm:$0xff]  ;;  %v491_v52 = vld [vmem:[#allocation8 + $0x38] sm:$0xff] }
  0xdb   : > { %842 = vmatprep.subr.mxu0 %v689_v59  ;;  %v490_v54 = vld [vmem:[#allocation8 + $0x30] sm:$0xff]  ;;  %v487_v56 = vld [vmem:[#allocation8 + $0x18] sm:$0xff] }
  0xdc   : > { %843 = vmatpush1.msra.mxu0 %v688_v60  ;;  %v486_v58 = vld [vmem:[#allocation8 + $0x10] sm:$0xff] }
  0xdd   : > { %844 = vmatprep.subr.mxu0 %v687_v61 }
  0xde   : > { %845 = vmatpush1.msra.mxu0 %v686_v62  ;;  %v775_v62 = vld [vmem:[#allocation9 + $0x2f8] sm:$0xff] }
  0xdf   : > { %846 = vmatprep.subr.mxu0 %v685_v63  ;;  %v774_v63 = vld [vmem:[#allocation9 + $0x2f0] sm:$0xff] }
  0xe0   : > { %847 = vmatpush1.msra.mxu0 %v684_v0  ;;  %v773_v0 = vld [vmem:[#allocation9 + $0x2e8] sm:$0xff] }
  0xe1   : > { %848 = vmatprep.subr.mxu0 %v683_v1  ;;  %v772_v1 = vld [vmem:[#allocation9 + $0x2e0] sm:$0xff] }
  0xe2   : > { %849 = vmatpush1.msra.mxu0 %v682_v2  ;;  %v771_v2 = vld [vmem:[#allocation9 + $0x2d8] sm:$0xff] }
  0xe3   : > { %850 = vmatprep.subr.mxu0 %v681_v3  ;;  %v770_v3 = vld [vmem:[#allocation9 + $0x2d0] sm:$0xff] }
  0xe4   : > { %851 = vmatpush1.msra.mxu0 %v680_v4  ;;  %v769_v4 = vld [vmem:[#allocation9 + $0x2c8] sm:$0xff] }
  0xe5   : > { %852 = vmatprep.subr.mxu0 %v743_v5  ;;  %v767_v5 = vld [vmem:[#allocation9 + $0x2b8] sm:$0xff] }
  0xe6   : > { %853 = vmatpush2.msra.mxu0 %v742_v6  ;;  %v766_v6 = vld [vmem:[#allocation9 + $0x2b0] sm:$0xff] }
  0xe7   : > { %854 = vmatprep.subr.mxu0 %v741_v7  ;;  %v765_v7 = vld [vmem:[#allocation9 + $0x2a8] sm:$0xff] }
  0xe8   : > { %855 = vmatpush2.msra.mxu0 %v740_v8  ;;  %v764_v8 = vld [vmem:[#allocation9 + $0x2a0] sm:$0xff] }
  0xe9   : > { %856 = vmatprep.subr.mxu0 %v739_v9  ;;  %v763_v9 = vld [vmem:[#allocation9 + $0x298] sm:$0xff] }
  0xea   : > { %857 = vmatpush2.msra.mxu0 %v738_v10  ;;  %v762_v10 = vld [vmem:[#allocation9 + $0x290] sm:$0xff] }
  0xeb   : > { %858 = vmatprep.subr.mxu0 %v737_v11  ;;  %v761_v11 = vld [vmem:[#allocation9 + $0x288] sm:$0xff] }
  0xec   : > { %859 = vmatpush2.msra.mxu0 %v736_v12  ;;  %v760_v12 = vld [vmem:[#allocation9 + $0x280] sm:$0xff] }
  0xed   : > { %860 = vmatprep.subr.mxu0 %v735_v13  ;;  %v759_v13 = vld [vmem:[#allocation9 + $0x278] sm:$0xff] }
  0xee   : > { %861 = vmatpush2.msra.mxu0 %v734_v14  ;;  %v758_v14 = vld [vmem:[#allocation9 + $0x270] sm:$0xff] }
  0xef   : > { %862 = vmatprep.subr.mxu0 %v733_v15  ;;  %v757_v15 = vld [vmem:[#allocation9 + $0x268] sm:$0xff] }
  0xf0   : > { %863 = vmatpush2.msra.mxu0 %v732_v16  ;;  %v756_v16 = vld [vmem:[#allocation9 + $0x260] sm:$0xff] }
  0xf1   : > { %864 = vmatprep.subr.mxu0 %v731_v17  ;;  %v755_v17 = vld [vmem:[#allocation9 + $0x258] sm:$0xff] }
  0xf2   : > { %865 = vmatpush2.msra.mxu0 %v730_v18  ;;  %v754_v18 = vld [vmem:[#allocation9 + $0x250] sm:$0xff] }
  0xf3   : > { %866 = vmatprep.subr.mxu0 %v729_v19  ;;  %v753_v19 = vld [vmem:[#allocation9 + $0x248] sm:$0xff] }
  0xf4   : > { %867 = vmatpush2.msra.mxu0 %v728_v20  ;;  %v752_v20 = vld [vmem:[#allocation9 + $0x240] sm:$0xff] }
  0xf5   : > { %868 = vmatprep.subr.mxu0 %v727_v21  ;;  %v751_v21 = vld [vmem:[#allocation9 + $0x238] sm:$0xff] }
  0xf6   : > { %869 = vmatpush2.msra.mxu0 %v726_v22  ;;  %v750_v22 = vld [vmem:[#allocation9 + $0x230] sm:$0xff] }
  0xf7   : > { %870 = vmatprep.subr.mxu0 %v725_v23  ;;  %v749_v23 = vld [vmem:[#allocation9 + $0x228] sm:$0xff] }
  0xf8   : > { %871 = vmatpush2.msra.mxu0 %v724_v24  ;;  %v748_v24 = vld [vmem:[#allocation9 + $0x220] sm:$0xff] }
  0xf9   : > { %872 = vmatprep.subr.mxu0 %v723_v25  ;;  %v747_v25 = vld [vmem:[#allocation9 + $0x218] sm:$0xff] }
  0xfa   : > { %873 = vmatpush2.msra.mxu0 %v722_v27  ;;  %v746_v27 = vld [vmem:[#allocation9 + $0x210] sm:$0xff] }
  0xfb   : > { %874 = vmatprep.subr.mxu0 %v721_v28  ;;  %v745_v28 = vld [vmem:[#allocation9 + $0x208] sm:$0xff] }
  0xfc   : > { %875 = vmatpush2.msra.mxu0 %v720_v29  ;;  %v744_v29 = vld [vmem:[#allocation9 + $0x200] sm:$0xff] }
 0x153   : > { %v475_v32 = vpop.xlane.xlu1 %474 }
 0x154   : > { %v480_v37 = vmul.f32 0.00625, %v475_v32  ;;  %v805_v32 = vld [vmem:[#allocation9 + $0x3e8] sm:$0xff] }
 0x155   : > { %v479_v30 = vpop.xlane.xlu0 %478 }
 0x156   : > { %v482_v34 = vmul.f32 0.00625, %v479_v30  ;;  %v497_v47 = vmul.f32 %v485_v42, %v480_v37  ;;  %v496_v48 = vmul.f32 %v484_v44, %v480_v37  ;;  %v499_v60 = vmul.f32 %v487_v56, %v480_v37  ;;  %v807_v30 = vld [vmem:[#allocation9 + $0x3f8] sm:$0xff]  ;;  %v796_v42 = vld [vmem:[#allocation9 + $0x3a0] sm:$0xff]  ;;  %v794_v44 = vld [vmem:[#allocation9 + $0x390] sm:$0xff] }
 0x157   : > { %v498_v61 = vmul.f32 %v486_v58, %v480_v37  ;;  %v801_v37 = vld [vmem:[#allocation9 + $0x3c8] sm:$0xff]  ;;  %v786_v56 = vld [vmem:[#allocation9 + $0x350] sm:$0xff] }
 0x158   : > { %v505_v35 = vmul.f32 %v493_v31, %v482_v34  ;;  %v504_v38 = vmul.f32 %v492_v33, %v482_v34  ;;  %v507_v53 = vmul.f32 %v495_v49, %v482_v34  ;;  %v506_v55 = vmul.f32 %v494_v50, %v482_v34  ;;  %v806_v31 = vld [vmem:[#allocation9 + $0x3f0] sm:$0xff]  ;;  %v804_v33 = vld [vmem:[#allocation9 + $0x3e0] sm:$0xff]  ;;  %v803_v34 = vld [vmem:[#allocation9 + $0x3d8] sm:$0xff] }
 0x159   : > { %v477_v39 = vpop.xlane.xlu0 %476  ;;  %v719_v49 = vld [vmem:[#allocation9 + $0x138] sm:$0xff]  ;;  %v789_v50 = vld [vmem:[#allocation9 + $0x368] sm:$0xff] }
 0x15a   : > { %v481_v43 = vmul.f32 0.00625, %v477_v39  ;;  %560 = vmatprep.subr.mxu1 %v505_v35  ;;  %v802_v35 = vld [vmem:[#allocation9 + $0x3d0] sm:$0xff]  ;;  %v799_v39 = vld [vmem:[#allocation9 + $0x3b8] sm:$0xff]  ;;  %876 = vmatprep.subr.mxu0 %v719_v49  ;;  %v785_v58 = vld [vmem:[#allocation9 + $0x348] sm:$0xff] }
 0x15b   : > { %561 = vmatpush1.msra.mxu1 %v504_v38  ;;  %v800_v38 = vld [vmem:[#allocation9 + $0x3c0] sm:$0xff]  ;;  %v985_v49 = vld [vmem:[#allocation11 + $0xa8] sm:$0xff] }
 0x15c   : > { %v501_v45 = vmul.f32 %v489_v40, %v481_v43  ;;  %v500_v46 = vmul.f32 %v488_v41, %v481_v43  ;;  %v503_v57 = vmul.f32 %v491_v52, %v481_v43  ;;  %v502_v59 = vmul.f32 %v490_v54, %v481_v43  ;;  %v798_v40 = vld [vmem:[#allocation9 + $0x3b0] sm:$0xff]  ;;  %v797_v41 = vld [vmem:[#allocation9 + $0x3a8] sm:$0xff]  ;;  %v795_v43 = vld [vmem:[#allocation9 + $0x398] sm:$0xff] }
 0x15d   : > { %v788_v52 = vld [vmem:[#allocation9 + $0x360] sm:$0xff]  ;;  %v787_v54 = vld [vmem:[#allocation9 + $0x358] sm:$0xff] }
 0x15e   : > { %562 = vmatprep.subr.mxu1 %v501_v45  ;;  %v793_v45 = vld [vmem:[#allocation9 + $0x388] sm:$0xff] }
 0x15f   : > { %563 = vmatpush1.msra.mxu1 %v500_v46  ;;  %v792_v46 = vld [vmem:[#allocation9 + $0x380] sm:$0xff] }
 0x160   : > { %564 = vmatprep.subr.mxu1 %v497_v47  ;;  %v791_v47 = vld [vmem:[#allocation9 + $0x378] sm:$0xff] }
 0x161   : > { %565 = vmatpush1.msra.mxu1 %v496_v48  ;;  %v790_v48 = vld [vmem:[#allocation9 + $0x370] sm:$0xff] }
 0x162   : > { %1234 = vmatmul.mubr.msk.f32.vlgmr.msra.gmra.mxu1 %vm530_vm4, %v483_v51  ;;  %631 = vmatprep.subr.mxu1 %v507_v53  ;;  %v717_v53 = vld [vmem:[#allocation9 + $0x128] sm:$0xff] }
 0x163   : > { %632 = vmatpush1.msra.mxu1 %v506_v55  ;;  %669 = vmatprep.mubr.f32.mxu1 %v1702_v36  ;;  %v768_v36 = vld [vmem:[#allocation9 + $0x2c0] sm:$0xff] }
 0x164   : > { %633 = vmatprep.subr.mxu1 %v503_v57  ;;  %v716_v55 = vld [vmem:[#allocation9 + $0x120] sm:$0xff]  ;;  %v715_v57 = vld [vmem:[#allocation9 + $0x118] sm:$0xff] }
 0x165   : > { %634 = vmatpush1.msra.mxu1 %v502_v59  ;;  %v714_v59 = vld [vmem:[#allocation9 + $0x110] sm:$0xff] }
 0x166   : > { %635 = vmatprep.subr.mxu1 %v499_v60  ;;  %v784_v60 = vld [vmem:[#allocation9 + $0x340] sm:$0xff] }
 0x167   : > { %636 = vmatpush1.msra.mxu1 %v498_v61  ;;  %v713_v61 = vld [vmem:[#allocation9 + $0x108] sm:$0xff] }
 0x168   : > { %1235 = vmatmul.mubr.msk.f32.vlgmr.msra.gmra.mxu1 %vm530_vm4, %v483_v51  ;;  %891 = vmatprep.subr.mxu1 %v775_v62  ;;  %v718_v51 = vld [vmem:[#allocation9 + $0x130] sm:$0xff]  ;;  %v783_v62 = vld [vmem:[#allocation9 + $0x338] sm:$0xff] }
 0x169   : > { %892 = vmatpush1.msra.mxu1 %v774_v63  ;;  %877 = vmatpush2.msra.mxu0 %v718_v51  ;;  %v712_v63 = vld [vmem:[#allocation9 + $0x100] sm:$0xff] }
 0x16a   : > { %893 = vmatprep.subr.mxu1 %v773_v0  ;;  %878 = vmatprep.subr.mxu0 %v717_v53  ;;  %v782_v0 = vld [vmem:[#allocation9 + $0x330] sm:$0xff]  ;;  %v984_v51 = vld [vmem:[#allocation11 + $0xa0] sm:$0xff]  ;;  %v983_v53 = vld [vmem:[#allocation11 + $0x98] sm:$0xff] }
 0x16b   : > { %894 = vmatpush1.msra.mxu1 %v772_v1  ;;  %879 = vmatpush2.msra.mxu0 %v716_v55  ;;  %v781_v1 = vld [vmem:[#allocation9 + $0x328] sm:$0xff]  ;;  %v982_v55 = vld [vmem:[#allocation11 + $0x90] sm:$0xff] }
 0x16c   : > { %895 = vmatprep.subr.mxu1 %v771_v2  ;;  %880 = vmatprep.subr.mxu0 %v715_v57  ;;  %v780_v2 = vld [vmem:[#allocation9 + $0x320] sm:$0xff]  ;;  %v981_v57 = vld [vmem:[#allocation11 + $0x88] sm:$0xff] }
 0x16d   : > { %896 = vmatpush1.msra.mxu1 %v770_v3  ;;  %881 = vmatpush2.msra.mxu0 %v714_v59  ;;  %v779_v3 = vld [vmem:[#allocation9 + $0x318] sm:$0xff]  ;;  %v980_v59 = vld [vmem:[#allocation11 + $0x80] sm:$0xff] }
 0x16e   : > { %897 = vmatprep.subr.mxu1 %v769_v4  ;;  %882 = vmatprep.subr.mxu0 %v713_v61  ;;  %v778_v4 = vld [vmem:[#allocation9 + $0x310] sm:$0xff] }
 0x16f   : > { %898 = vmatpush1.msra.mxu1 %v768_v36  ;;  %883 = vmatpush2.msra.mxu0 %v712_v63  ;;  %v777_v36 = vld [vmem:[#allocation9 + $0x308] sm:$0xff]  ;;  %v808_v61 = vld [vmem:[%s2110_s8] sm:$0x3] }
 0x170   : > { %899 = vmatprep.subr.mxu1 %v767_v5  ;;  %v776_v5 = vld [vmem:[#allocation9 + $0x300] sm:$0xff] }
 0x171   : > { %900 = vmatpush1.msra.mxu1 %v766_v6  ;;  %v995_v6 = vld [vmem:[#allocation11 + $0xf8] sm:$0xff] }
 0x172   : > { %901 = vmatprep.subr.mxu1 %v765_v7  ;;  %1242 = vmatprep.subr.mxu0 %v995_v6  ;;  %v512_v7 = vsub.s32 0, %v1980_v26 }
 0x173   : > { %902 = vmatpush1.msra.mxu1 %v764_v8  ;;  %v508_v8 = vld [vmem:[%s2072_s3] sm:$0xf] }
 0x174   : > { %903 = vmatprep.subr.mxu1 %v763_v9  ;;  %v516_v9 = vsub.s32 1, %v1980_v26  ;;  %v813_v63 = vrot.slane %v808_v61, %v512_v7 }
 0x175   : > { %904 = vmatpush1.msra.mxu1 %v762_v10  ;;  %v513_v10 = vrot.slane %v508_v8, %v512_v7  ;;  %v1236_v7 = vld [vmem:[%s2111_s24] ss:$0 sm:$0xff] }
 0x176   : > { %905 = vmatprep.subr.mxu1 %v761_v11  ;;  %v517_v11 = vrot.slane %v508_v8, %v516_v9 }
 0x177   : > { %906 = vmatpush1.msra.mxu1 %v760_v12 }
 0x178   : > { %907 = vmatprep.subr.mxu1 %v759_v13  ;;  %v520_v13 = vsub.s32 2, %v1980_v26 }
 0x179   : > { %908 = vmatpush1.msra.mxu1 %v758_v14  ;;  %v524_v14 = vsub.s32 3, %v1980_v26 }
 0x17a   : > { %909 = vmatprep.subr.mxu1 %v757_v15 }
 0x17b   : > { %910 = vmatpush1.msra.mxu1 %v756_v16 }
 0x17c   : > { %911 = vmatprep.subr.mxu1 %v755_v17 }
 0x17d   : > { %912 = vmatpush1.msra.mxu1 %v754_v18  ;;  %v521_v18 = vrot.slane %v508_v8, %v520_v13 }
 0x17e   : > { %913 = vmatprep.subr.mxu1 %v753_v19 }
 0x17f   : > { %914 = vmatpush1.msra.mxu1 %v752_v20  ;;  %v525_v20 = vrot.slane %v508_v8, %v524_v14 }
 0x180   : > { %915 = vmatprep.subr.mxu1 %v751_v21 }
 0x181   : > { %916 = vmatpush1.msra.mxu1 %v750_v22 }
 0x182   : > { %917 = vmatprep.subr.mxu1 %v749_v23  ;;  %v979_v23 = vld [vmem:[#allocation11 + $0x78] sm:$0xff] }
 0x183   : > { %918 = vmatpush1.msra.mxu1 %v748_v24  ;;  %v994_v24 = vld [vmem:[#allocation11 + $0xf0] sm:$0xff] }
 0x184   : > { %919 = vmatprep.subr.mxu1 %v747_v25 }
 0x185   : > { %920 = vmatpush1.msra.mxu1 %v746_v27 }
 0x186   : > { %921 = vmatprep.subr.mxu1 %v745_v28  ;;  %v978_v28 = vld [vmem:[#allocation11 + $0x70] sm:$0xff] }
 0x187   : > { %922 = vmatpush1.msra.mxu1 %v744_v29 }
 0x188   : > { %923 = vmatprep.subr.mxu1 %v807_v30  ;;  %v993_v30 = vld [vmem:[#allocation11 + $0xe8] sm:$0xff] }
 0x189   : > { %924 = vmatpush2.msra.mxu1 %v806_v31  ;;  %v977_v31 = vld [vmem:[#allocation11 + $0x68] sm:$0xff] }
 0x18a   : > { %925 = vmatprep.subr.mxu1 %v805_v32 }
 0x18b   : > { %926 = vmatpush2.msra.mxu1 %v804_v33  ;;  %v992_v33 = vld [vmem:[#allocation11 + $0xe0] sm:$0xff] }
 0x18c   : > { %927 = vmatprep.subr.mxu1 %v803_v34 }
 0x18d   : > { %928 = vmatpush2.msra.mxu1 %v802_v35  ;;  %v976_v35 = vld [vmem:[#allocation11 + $0x60] sm:$0xff] }
 0x18e   : > { %929 = vmatprep.subr.mxu1 %v801_v37  ;;  %v991_v37 = vld [vmem:[#allocation11 + $0xd8] sm:$0xff] }
 0x18f   : > { %930 = vmatpush2.msra.mxu1 %v800_v38  ;;  %v975_v38 = vld [vmem:[#allocation11 + $0x58] sm:$0xff] }
 0x190   : > { %931 = vmatprep.subr.mxu1 %v799_v39  ;;  %v990_v39 = vld [vmem:[#allocation11 + $0xd0] sm:$0xff] }
 0x191   : > { %932 = vmatpush2.msra.mxu1 %v798_v40  ;;  %v974_v40 = vld [vmem:[#allocation11 + $0x50] sm:$0xff] }
 0x192   : > { %933 = vmatprep.subr.mxu1 %v797_v41  ;;  %v989_v41 = vld [vmem:[#allocation11 + $0xc8] sm:$0xff] }
 0x193   : > { %934 = vmatpush2.msra.mxu1 %v796_v42  ;;  %v973_v42 = vld [vmem:[#allocation11 + $0x48] sm:$0xff] }
 0x194   : > { %935 = vmatprep.subr.mxu1 %v795_v43  ;;  %v988_v43 = vld [vmem:[#allocation11 + $0xc0] sm:$0xff] }
 0x195   : > { %936 = vmatpush2.msra.mxu1 %v794_v44  ;;  %v972_v44 = vld [vmem:[#allocation11 + $0x40] sm:$0xff] }
 0x196   : > { %937 = vmatprep.subr.mxu1 %v793_v45  ;;  %v987_v45 = vld [vmem:[#allocation11 + $0xb8] sm:$0xff] }
 0x197   : > { %938 = vmatpush2.msra.mxu1 %v792_v46  ;;  %v971_v46 = vld [vmem:[#allocation11 + $0x38] sm:$0xff] }
 0x198   : > { %939 = vmatprep.subr.mxu1 %v791_v47  ;;  %v986_v47 = vld [vmem:[#allocation11 + $0xb0] sm:$0xff] }
 0x199   : > { %940 = vmatpush2.msra.mxu1 %v790_v48  ;;  %v970_v48 = vld [vmem:[#allocation11 + $0x30] sm:$0xff] }
 0x19a   : > { %941 = vmatprep.subr.mxu1 %v789_v50  ;;  %v969_v50 = vld [vmem:[#allocation11 + $0x28] sm:$0xff] }
 0x19b   : > { %942 = vmatpush2.msra.mxu1 %v788_v52  ;;  %v968_v52 = vld [vmem:[#allocation11 + $0x20] sm:$0xff] }
 0x19c   : > { %943 = vmatprep.subr.mxu1 %v787_v54  ;;  %v967_v54 = vld [vmem:[#allocation11 + $0x18] sm:$0xff] }
 0x19d   : > { %944 = vmatpush2.msra.mxu1 %v786_v56  ;;  %v966_v56 = vld [vmem:[#allocation11 + $0x10] sm:$0xff] }
 0x19e   : > { %945 = vmatprep.subr.mxu1 %v785_v58  ;;  %v965_v58 = vld [vmem:[#allocation11 + $0x8] sm:$0xff] }
 0x19f   : > { %946 = vmatpush2.msra.mxu1 %v784_v60  ;;  %v964_v60 = vld [vmem:[#allocation11] sm:$0xff] }
 0x1a0   : > { %947 = vmatprep.subr.mxu1 %v783_v62 }
 0x1a1   : > { %948 = vmatpush2.msra.mxu1 %v782_v0  ;;  %v817_v0 = vrot.slane %v808_v61, %v516_v9 }
 0x1a2   : > { %949 = vmatprep.subr.mxu1 %v781_v1 }
 0x1a3   : > { %950 = vmatpush2.msra.mxu1 %v780_v2 }
 0x1a4   : > { %951 = vmatprep.subr.mxu1 %v779_v3 }
 0x1a5   : > { %952 = vmatpush2.msra.mxu1 %v778_v4 }
 0x1a6   : > { %953 = vmatprep.subr.mxu1 %v777_v36 }
 0x1a7   : > { %954 = vmatpush2.msra.mxu1 %v776_v5 }
 0x222   : > { %v600_v12 = vpop.f32.mrf.mxu1 }
 0x223   : > { %v601_v15 = vadd.f32 %v600_v12, %v513_v10 }
 0x224   : > { %v602_v16 = vpop.f32.mrf.mxu1 }
 0x225   : > { %v603_v17 = vadd.f32 %v602_v16, %v517_v11  ;;  %v676_v21 = vmax.f32 %v601_v15, 0.0 }
 0x227   : > { %v677_v19 = vmax.f32 %v603_v17, 0.0 }
 0x228   : > { %v671_v22 = vpop.f32.mrf.mxu1 }
 0x229   : > { %884 = vmatprep.mubr.f32.mxu0 %v677_v19  ;;  %v672_v25 = vadd.f32 %v671_v22, %v521_v18 }
 0x22a   : > { %v673_v27 = vpop.f32.mrf.mxu1  ;;  %885 = vmatmul.mubr.f32.vlgmr.msra.gmra.mxu0 %v676_v21 }
 0x22b   : > { %v674_v29 = vadd.f32 %v673_v27, %v525_v20  ;;  %1243 = vmatpush3.msra.mxu0 %v979_v23  ;;  %v678_v34 = vmax.f32 %v672_v25, 0.0 }
 0x22c   : > { %1244 = vmatprep.subr.mxu0 %v994_v24 }
 0x22d   : > { %v679_v32 = vmax.f32 %v674_v29, 0.0  ;;  %1245 = vmatpush3.msra.mxu0 %v978_v28 }
 0x22e   : > { %1246 = vmatprep.subr.mxu0 %v993_v30 }
 0x22f   : > { %955 = vmatprep.mubr.f32.mxu1 %v679_v32  ;;  %1247 = vmatpush3.msra.mxu0 %v977_v31 }
 0x230   : > { %956 = vmatmul.mubr.f32.vlgmr.msra.gmra.mxu1 %v678_v34  ;;  %1248 = vmatprep.subr.mxu0 %v992_v33 }
 0x231   : > { %1249 = vmatpush3.msra.mxu0 %v976_v35 }
 0x232   : > { %1250 = vmatprep.subr.mxu0 %v991_v37 }
 0x233   : > { %1251 = vmatpush3.msra.mxu0 %v975_v38 }
 0x234   : > { %1252 = vmatprep.subr.mxu0 %v990_v39 }
 0x235   : > { %1253 = vmatpush3.msra.mxu0 %v974_v40 }
 0x236   : > { %1254 = vmatprep.subr.mxu0 %v989_v41 }
 0x237   : > { %1255 = vmatpush3.msra.mxu0 %v973_v42 }
 0x238   : > { %1256 = vmatprep.subr.mxu0 %v988_v43 }
 0x239   : > { %1257 = vmatpush3.msra.mxu0 %v972_v44 }
 0x23a   : > { %1258 = vmatprep.subr.mxu0 %v987_v45 }
 0x23b   : > { %1259 = vmatpush3.msra.mxu0 %v971_v46 }
 0x23c   : > { %1260 = vmatprep.subr.mxu0 %v986_v47 }
 0x23d   : > { %1261 = vmatpush3.msra.mxu0 %v970_v48 }
 0x23e   : > { %1262 = vmatprep.subr.mxu0 %v985_v49 }
 0x23f   : > { %1263 = vmatpush3.msra.mxu0 %v969_v50 }
 0x240   : > { %1264 = vmatprep.subr.mxu0 %v984_v51 }
 0x241   : > { %1265 = vmatpush3.msra.mxu0 %v968_v52 }
 0x242   : > { %1266 = vmatprep.subr.mxu0 %v983_v53 }
 0x243   : > { %1267 = vmatpush3.msra.mxu0 %v967_v54 }
 0x244   : > { %1268 = vmatprep.subr.mxu0 %v982_v55 }
 0x245   : > { %1269 = vmatpush3.msra.mxu0 %v966_v56 }
 0x246   : > { %1270 = vmatprep.subr.mxu0 %v981_v57 }
 0x247   : > { %1271 = vmatpush3.msra.mxu0 %v965_v58 }
 0x248   : > { %1272 = vmatprep.subr.mxu0 %v980_v59 }
 0x249   : > { %1273 = vmatpush3.msra.mxu0 %v964_v60 }
 0x2ea   : > { %v886_v62 = vpop.f32.mrf.mxu0 }
 0x2eb   : > { %v887_v2 = vadd.f32 %v886_v62, %v813_v63 }
 0x2ec   : > { %v888_v1 = vpop.f32.mrf.mxu0 }
 0x2ed   : > { %v889_v4 = vadd.f32 %v888_v1, %v817_v0 }
 0x2f0   : > { %v957_v3 = vpop.f32.mrf.mxu1 }
 0x2f1   : > { %v958_v36 = vadd.f32 %v957_v3, %v887_v2 }
 0x2f2   : > { %v959_v5 = vpop.f32.mrf.mxu1 }
 0x2f3   : > { %v960_v6 = vadd.f32 %v959_v5, %v889_v4  ;;  %v962_v10 = vmax.f32 %v958_v36, 0.0 }
 0x2f5   : > { %v963_v8 = vmax.f32 %v960_v6, 0.0 }
 0x2f7   : > { %1067 = vmatprep.mubr.f32.mxu0 %v963_v8 }
 0x2f8   : > { %1068 = vmatmul.mubr.f32.vlgmr.msra.gmra.mxu0 %v962_v10 }
 0x3b8   : > { %v1274_v11 = vpop.f32.mrf.mxu0 }
 0x3ba   : > { %v1275_v12 = vpop.f32.mrf.mxu0 }
 0x3bb   : > { %v1276_v26 = vadd.f32 %v1275_v12, %v1274_v11 }
 0x3bd   : > { %v1070_v9 = vadd.f32 %v1276_v26, %v1236_v7 }
 0x3bf   : > { %1073 = vst [vmem:[%s401_s25] sm:$0xff] %v1070_v9 }
 0x3c0 PF: > { %s1238_s22 = sshll.u32 %s1673_s12, 7  ;;  %s2112_s1 = sld [smem:[#allocation26_spill]] }
 0x3c1   : > { %s1088_s20 = sshll.u32 %s401_s25, 4  ;;  %s1075_s11 = scalar_lea.sflag [#allocation5], %s399_s16  ;;  %s1089_s20 = int_to_ptr.vmem [resolvable:$true] %s1088_s20 }
 0x3c2   : > { %s1557_s19 = scalar_lea.vmem %s1089_s20, 128  ;;  %p2113_p8 = scmp.ne.s32.totalorder %s2098_s18, 0 }
 0x3c3   : > { %p1558_p2 = scmp.ne.s32.totalorder %s1089_s20, %s1557_s19  ;;  %s1703_s30 = smov [#allocation12]  }
 0x3c4   : > { %s1561_s2 = sshll.u32 %s1703_s30, 4  ;;  %s1562_s2 = int_to_ptr.vmem [resolvable:$false] %s1561_s2 }
 0x3c5   : > { %p1559_p11 = pnand %p1558_p2, %p2113_p8  ;;  %s1563_s8 = scalar_lea.vmem %s1562_s2, 256 }
 0x3c6   : > { %s1086_s21 = scalar_lea.hbm %s2112_s1, %s1238_s22  ;;  %p1564_p4 = scmp.lt.s32.totalorder %s1089_s20, %s1562_s2 }
 0x3c7   : > { %p1560_p13 = pneg %p1559_p11  ;;  %p1565_p6 = scmp.lt.s32.totalorder %s1563_s8, %s1557_s19 }
 0x3c9   : > { %p1566_p12 = por %p1565_p6, %p1564_p4 }
 0x3cb   : > { %p1567_p0 = pnand %p1566_p12, %p1560_p13 }
 0x3cd   : > { %1570 = shalt.err (!%p1567_p0)
}
 0x3ce   : > { %s1571_s12 = scalar_lea.hbm %s1086_s21, 128  ;;  %s1575_s25 = scalar_lea.hbm %s2112_s1, 256 }
 0x3cf   : > { %p1572_p10 = scmp.ne.s32.totalorder %s1086_s21, %s1571_s12  ;;  %p1576_p9 = scmp.lt.s32.totalorder %s1086_s21, %s2112_s1 }
 0x3d0   : > { %p1577_p3 = scmp.lt.s32.totalorder %s1575_s25, %s1571_s12 }
 0x3d1   : > { %p1573_p1 = pnand %p1572_p10, %p2113_p8 }
 0x3d2   : > { %p1578_p5 = por %p1577_p3, %p1576_p9 }
 0x3d3   : > { %p1574_p7 = pneg %p1573_p1 }
 0x3d5   : > { %p1579_p2 = pnand %p1578_p5, %p1574_p7 }
 0x3d7   : > { %1582 = shalt.err (!%p1579_p2)
}
 0x3d8   : > { %1296 = dma.vmem_to_hbm [thread:$0]  (%p2113_p8), %s1089_s20, 128, %s1086_s21, %s1075_s11  }
 0x3d9 PF: > { %p1323_p11 = scmp.ge.s32.totalorder %s1685_s15, 2  ;;  %s1100_s24 = sand.u32 1, %s1645_s27  }
 0x3da   : > { %p2114_p13 = scmp.ne.s32.totalorder %s2101_s5, 0  ;;  %s1101_s22 = scalar_lea.sflag [#allocation5], %s1100_s24 }
 0x3dc   : > { %p1312_p4 = pnand %p1323_p11, %p2114_p13 }
 0x3de   : > { %p1313_p6 = pneg %p1312_p4 }
 0x3e0   : > { %1640 = dma.done.wait (%p1313_p6), %s1101_s22, 128  }
 0x3e1   : > { %1642 = vsyncadd (%p1313_p6), %s1101_s22, 4294967168  ;;  %s26_s15 = sadd.s32 1, %s1685_s15   ;;  %s2115_s26 = sld [smem:[#allocation17_spill]] }
 0x3e2   : > { %p23_p12 = scmp.ge.s32.totalorder %s26_s15, 6   ;;  %s2116_s29 = sld [smem:[#allocation20_spill]] }
 0x3e3   : > { %s2117_s18 = sld [smem:[#allocation21_spill]]  ;;  %s2120_s27 = smov %s1649_s28 }
 0x3e4   : > { %s2118_s23 = sld [smem:[#allocation18_spill]]  ;;  %s2122_s30 = smov %s1661_s9 }
 0x3e5   : > { %s2119_s21 = sld [smem:[#allocation19_spill]]  ;;  %s2123_s9 = smov %s1665_s10 }
 0x3e6   : > { %s2125_s11 = smov %s1677_s13  ;;  %s2126_s12 = smov %s1681_s14 }
 0x3e7   : > { %s2121_s28 = smov %s2115_s26  ;;  %25 = sbr.rel (!%p23_p12) target bundleno = 17 (0x11), region = 129 }
 0x3e9   : > { %s2124_s10 = smov %s2117_s18 }
 0x3ea   : > { %s2127_s13 = smov %s2118_s23 }
 0x3eb   : > { %s2128_s14 = smov %s2119_s21 }
 0x3ec   :  { %1106 = vsyncpa [#allocation4], 1 }
 0x3ed   :  { %1108 = vsyncpa [#allocation4 + $0x1], 1 }
 0x3ee   :  { %1109 = vsyncpa [#allocation7], 1 }
 0x3ef   :  { %1110 = vsyncpa [#allocation10], 1 }
 0x3f0   :  { %1111 = vsyncpa [#allocation5], 1 }
 0x3f1   :  { %1113 = vsyncpa [#allocation5 + $0x1], 1 }

</bundles_post_ra>
